<compile_context>
chip_gen: v7x
topology: tpu7x:2x2x1
jax: 0.10.0
libtpu: 0.0.40
codegen_flags: <defaults>
</compile_context>

<pallas_src>
import functools

import jax
import jax.numpy as jnp
from jax import lax
from jax.experimental import pallas as pl
from jax.experimental.pallas import tpu as pltpu

EPS = 1e-6


def _flow_attention_kernel(mblk_ref, q_ref, k_ref, v_ref, o_ref, *, lq, lk):
    f32 = jnp.float32
    mblk = mblk_ref[...]                               # (HD, HD) same-head mask
    q = jax.nn.sigmoid(q_ref[0].astype(f32))           # (Lq, HD)
    k = jax.nn.sigmoid(k_ref[0].astype(f32))           # (Lk, HD)
    v = v_ref[0].astype(f32)                           # (Lk, HD)   (M == D)

    row_contract = (((0,), (0,)), ((), ()))            # contract the L (row) axis
    col_contract = (((1,), (0,)), ((), ()))            # plain matmul

    def head_sum(x):
        # Per-head sum over the D lanes of each head, replicated back across those
        # lanes (x @ block_ones).  Keeps everything (rows, 128) lane-dense.
        return lax.dot_general(x, mblk, col_contract, preferred_element_type=f32)

    k_sum = jnp.sum(k, axis=0, keepdims=True) + EPS    # (1, HD)
    q_sum = jnp.sum(q, axis=0, keepdims=True) + EPS    # (1, HD)

    sink_incoming = pl.reciprocal(head_sum((q + EPS) * k_sum), approx=True)    # (Lq, HD)
    source_outgoing = pl.reciprocal(head_sum((k + EPS) * q_sum), approx=True)  # (Lk, HD)

    k_weighted = jnp.sum(k * source_outgoing, axis=0, keepdims=True) + EPS     # (1, HD)
    q_weighted = jnp.sum(q * sink_incoming, axis=0, keepdims=True) + EPS       # (1, HD)

    conserved_sink = head_sum((q + EPS) * k_weighted)                          # (Lq, HD)
    conserved_source = head_sum((k + EPS) * q_weighted)                        # (Lk, HD)
    conserved_source = jnp.clip(conserved_source, -1.0, 1.0)

    sink_allocation = jax.nn.sigmoid(conserved_sink * (float(lq) / float(lk)))  # (Lq, HD)

    # softmax over the sequence axis (rows), per head (columns are head-replicated)
    cs_max = jnp.max(conserved_source, axis=0, keepdims=True)
    cs_exp = jnp.exp(conserved_source - cs_max)
    cs_den = jnp.sum(cs_exp, axis=0, keepdims=True)
    source_competition = cs_exp * pl.reciprocal(cs_den, approx=True) * float(lk)  # (Lk, HD)

    # dot_product: kv = 'ld,lm->dm' per head  (contract L directly; mask cross-head),
    #              qkv = 'ld,dm->lm' per head (block-diagonal kv keeps heads separate)
    kv = lax.dot_general(k, v * source_competition, row_contract,
                         preferred_element_type=f32) * mblk                    # (HD, HD)
    qkv = lax.dot_general(q * sink_incoming, kv, col_contract,
                          preferred_element_type=f32)                          # (Lq, HD)

    o_ref[0] = (qkv * sink_allocation).astype(o_ref.dtype)


def flow_attention(queries, keys, values, biases=None):
    """queries: [*, Lq, H, D], keys/values: [*, Lk, H, D] -> [*, Lq, H, D]."""
    del biases  # PAIR_FACTOR=False path: biases unused.
    shape_q = queries.shape
    lq, h, d = shape_q[-3:]
    lk = keys.shape[-3]
    assert keys.shape[-2:] == (h, d)
    assert values.shape[-1] == d  # TODO(synk): D != M (PAIR_FACTOR concat) not supported.
    hd = h * d

    # Native layout: just collapse (H, D) -> H*D and leading dims -> N.  No transposes.
    q = queries.reshape(-1, lq, hd)
    k = keys.reshape(-1, lk, hd)
    v = values.reshape(-1, lk, hd)
    n = q.shape[0]

    # Same-head block mask: mblk[p, q] = 1 iff lane p and lane q belong to the same head.
    lane_head = jnp.arange(hd) // d
    mblk = (lane_head[:, None] == lane_head[None, :]).astype(jnp.float32)

    kernel = functools.partial(_flow_attention_kernel, lq=lq, lk=lk)

    # Advisory cost estimate (memory-bound op; help XLA schedule around it).
    flops = 2 * n * hd * hd * (lq + lk + 4 * max(lq, lk))
    bytes_accessed = 4 * n * hd * (2 * lq + 2 * lk) + 4 * hd * hd
    transcendentals = n * hd * (3 * lk + 3 * lq)

    out = pl.pallas_call(
        kernel,
        out_shape=jax.ShapeDtypeStruct((n, lq, hd), queries.dtype),
        grid_spec=pltpu.PrefetchScalarGridSpec(
            num_scalar_prefetch=0,
            grid=(n,),
            in_specs=[
                pl.BlockSpec((hd, hd), lambda i: (0, 0)),      # resident head mask
                pl.BlockSpec((1, lq, hd), lambda i: (i, 0, 0)),
                pl.BlockSpec((1, lk, hd), lambda i: (i, 0, 0)),
                pl.BlockSpec((1, lk, hd), lambda i: (i, 0, 0)),
            ],
            out_specs=pl.BlockSpec((1, lq, hd), lambda i: (i, 0, 0)),
        ),
        compiler_params=pltpu.CompilerParams(
            dimension_semantics=("parallel",)),
        cost_estimate=pl.CostEstimate(
            flops=flops,
            transcendentals=transcendentals,
            bytes_accessed=bytes_accessed),
    )(mblk, q, k, v)

    # (N, Lq, H*D) row-major == (..., Lq, H, D): plain reshape, no transpose needed.
    out = out.reshape(shape_q)
    # dropout(p=0.05) is identity at inference time.
    return out


def _reference(queries, keys, values):
    """Pure-JAX reference mirroring the PyTorch forward (PAIR_FACTOR=False)."""
    shape_q = queries.shape
    lq, h, d = shape_q[-3:]
    lk = keys.shape[-3]
    q = jnp.swapaxes(queries.reshape(-1, lq, h, d), -2, -3)
    k = jnp.swapaxes(keys.reshape(-1, lk, h, d), -2, -3)
    v = jnp.swapaxes(values.reshape(-1, lk, h, d), -2, -3)
    q = jax.nn.sigmoid(q)
    k = jax.nn.sigmoid(k)
    sink_in = 1.0 / jnp.einsum('nhld,nhd->nhl', q + EPS, k.sum(-2) + EPS)
    src_out = 1.0 / jnp.einsum('nhld,nhd->nhl', k + EPS, q.sum(-2) + EPS)
    cons_sink = jnp.einsum('nhld,nhd->nhl', q + EPS,
                           (k * src_out[..., None]).sum(-2) + EPS)
    cons_src = jnp.einsum('nhld,nhd->nhl', k + EPS,
                          (q * sink_in[..., None]).sum(-2) + EPS)
    cons_src = jnp.clip(cons_src, -1.0, 1.0)
    sink_alloc = jax.nn.sigmoid(cons_sink * (float(lq) / float(lk)))
    src_comp = jax.nn.softmax(cons_src, axis=-1) * float(lk)
    kv = jnp.einsum('nhld,nhlm->nhdm', k, v * src_comp[..., None])
    qkv = jnp.einsum('nhld,nhdm->nhlm', q * sink_in[..., None], kv)
    x = qkv * sink_alloc[..., None]
    x = jnp.swapaxes(x, -2, -3).reshape(shape_q)
    return x


if __name__ == "__main__":
    key = jax.random.PRNGKey(0)
    kq, kk, kv = jax.random.split(key, 3)

    B, L, H, D = 2, 16, 4, 32          # [batch, seq, heads, head_dim]
    queries = jax.random.normal(kq, (B, L, H, D), dtype=jnp.float32)
    keys = jax.random.normal(kk, (B, L, H, D), dtype=jnp.float32)
    values = jax.random.normal(kv, (B, L, H, D), dtype=jnp.float32)

    out = flow_attention(queries, keys, values, biases=None)
    out = jax.block_until_ready(out)

    ref = jax.block_until_ready(_reference(queries, keys, values))
    assert out.shape == queries.shape
    # Tolerance loosened vs. f32-exact because pl.reciprocal(approx=True) is used.
    assert jnp.allclose(out, ref, atol=1e-2, rtol=1e-2), "mismatch vs reference"

    print("KERNEL_OK")
</pallas_src>

<mosaic_0001>
module attributes {stable_mosaic.version = 11 : i64} {
  func.func @_flow_attention_kernel(%arg0: i32, %arg1: memref<128x128xf32, #tpu.memory_space<vmem>>, %arg2: memref<1x16x128xf32, #tpu.memory_space<vmem>>, %arg3: memref<1x16x128xf32, #tpu.memory_space<vmem>>, %arg4: memref<1x16x128xf32, #tpu.memory_space<vmem>>, %arg5: memref<1x16x128xf32, #tpu.memory_space<vmem>>) attributes {dimension_semantics = [#tpu.dimension_semantics<parallel>], iteration_bounds = array<i64: 2>, scalar_prefetch = 0 : i64, scratch_operands = 0 : i64, tpu.core_type = #tpu.core_type<tc>, window_params = [{pipeline_mode = #tpu.pipeline_mode<synchronous>, transform_indices = @transform_0, window_bounds = array<i64: 128, 128>}, {transform_indices = @transform_1, window_bounds = array<i64: 1, 16, 128>}, {transform_indices = @transform_2, window_bounds = array<i64: 1, 16, 128>}, {transform_indices = @transform_3, window_bounds = array<i64: 1, 16, 128>}, {transform_indices = @transform_4, window_bounds = array<i64: 1, 16, 128>}]} {
    %c0 = arith.constant 0 : index
    %c0_0 = arith.constant 0 : index
    %0 = vector.load %arg1[%c0, %c0_0] : memref<128x128xf32, #tpu.memory_space<vmem>>, vector<128x128xf32>
    %c0_1 = arith.constant 0 : index
    %c0_2 = arith.constant 0 : index
    %c0_3 = arith.constant 0 : index
    %1 = vector.load %arg2[%c0_1, %c0_2, %c0_3] : memref<1x16x128xf32, #tpu.memory_space<vmem>>, vector<1x16x128xf32>
    %2 = vector.shape_cast %1 : vector<1x16x128xf32> to vector<16x128xf32>
    %3 = arith.negf %2 : vector<16x128xf32>
    %4 = math.exp %3 : vector<16x128xf32>
    %cst = arith.constant 1.000000e+00 : f32
    %5 = vector.broadcast %cst : f32 to vector<16x128xf32>
    %6 = arith.addf %5, %4 : vector<16x128xf32>
    %7 = arith.divf %5, %6 : vector<16x128xf32>
    %c0_4 = arith.constant 0 : index
    %c0_5 = arith.constant 0 : index
    %c0_6 = arith.constant 0 : index
    %8 = vector.load %arg3[%c0_4, %c0_5, %c0_6] : memref<1x16x128xf32, #tpu.memory_space<vmem>>, vector<1x16x128xf32>
    %9 = vector.shape_cast %8 : vector<1x16x128xf32> to vector<16x128xf32>
    %10 = arith.negf %9 : vector<16x128xf32>
    %11 = math.exp %10 : vector<16x128xf32>
    %cst_7 = arith.constant 1.000000e+00 : f32
    %12 = vector.broadcast %cst_7 : f32 to vector<16x128xf32>
    %13 = arith.addf %12, %11 : vector<16x128xf32>
    %14 = arith.divf %12, %13 : vector<16x128xf32>
    %c0_8 = arith.constant 0 : index
    %c0_9 = arith.constant 0 : index
    %c0_10 = arith.constant 0 : index
    %15 = vector.load %arg4[%c0_8, %c0_9, %c0_10] : memref<1x16x128xf32, #tpu.memory_space<vmem>>, vector<1x16x128xf32>
    %16 = vector.shape_cast %15 : vector<1x16x128xf32> to vector<16x128xf32>
    %cst_11 = arith.constant dense<0.000000e+00> : vector<128xf32>
    %17 = vector.multi_reduction <add>, %14, %cst_11 [0] : vector<16x128xf32> to vector<128xf32>
    %18 = vector.shape_cast %17 : vector<128xf32> to vector<1x128xf32>
    %cst_12 = arith.constant 9.99999997E-7 : f32
    %19 = vector.broadcast %cst_12 : f32 to vector<1x128xf32>
    %20 = arith.addf %18, %19 : vector<1x128xf32>
    %cst_13 = arith.constant dense<0.000000e+00> : vector<128xf32>
    %21 = vector.multi_reduction <add>, %7, %cst_13 [0] : vector<16x128xf32> to vector<128xf32>
    %22 = vector.shape_cast %21 : vector<128xf32> to vector<1x128xf32>
    %cst_14 = arith.constant 9.99999997E-7 : f32
    %23 = vector.broadcast %cst_14 : f32 to vector<1x128xf32>
    %24 = arith.addf %22, %23 : vector<1x128xf32>
    %cst_15 = arith.constant 9.99999997E-7 : f32
    %25 = vector.broadcast %cst_15 : f32 to vector<16x128xf32>
    %26 = arith.addf %7, %25 : vector<16x128xf32>
    %27 = vector.broadcast %20 : vector<1x128xf32> to vector<16x128xf32>
    %28 = arith.mulf %26, %27 : vector<16x128xf32>
    %cst_16 = arith.constant dense<0.000000e+00> : vector<16x128xf32>
    %29 = tpu.matmul %28, %0, %cst_16 {dimension_numbers = #tpu.dot_dimension_numbers<[1], [0], [0], [1], [0, 0, 1, 1], [], []>} : vector<16x128xf32>, vector<128x128xf32>, vector<16x128xf32> -> vector<16x128xf32>
    %30 = tpu.reciprocal %29 {approx = true} : vector<16x128xf32> -> vector<16x128xf32>
    %cst_17 = arith.constant 9.99999997E-7 : f32
    %31 = vector.broadcast %cst_17 : f32 to vector<16x128xf32>
    %32 = arith.addf %14, %31 : vector<16x128xf32>
    %33 = vector.broadcast %24 : vector<1x128xf32> to vector<16x128xf32>
    %34 = arith.mulf %32, %33 : vector<16x128xf32>
    %cst_18 = arith.constant dense<0.000000e+00> : vector<16x128xf32>
    %35 = tpu.matmul %34, %0, %cst_18 {dimension_numbers = #tpu.dot_dimension_numbers<[1], [0], [0], [1], [0, 0, 1, 1], [], []>} : vector<16x128xf32>, vector<128x128xf32>, vector<16x128xf32> -> vector<16x128xf32>
    %36 = tpu.reciprocal %35 {approx = true} : vector<16x128xf32> -> vector<16x128xf32>
    %37 = arith.mulf %14, %36 : vector<16x128xf32>
    %cst_19 = arith.constant dense<0.000000e+00> : vector<128xf32>
    %38 = vector.multi_reduction <add>, %37, %cst_19 [0] : vector<16x128xf32> to vector<128xf32>
    %39 = vector.shape_cast %38 : vector<128xf32> to vector<1x128xf32>
    %cst_20 = arith.constant 9.99999997E-7 : f32
    %40 = vector.broadcast %cst_20 : f32 to vector<1x128xf32>
    %41 = arith.addf %39, %40 : vector<1x128xf32>
    %42 = arith.mulf %7, %30 : vector<16x128xf32>
    %cst_21 = arith.constant dense<0.000000e+00> : vector<128xf32>
    %43 = vector.multi_reduction <add>, %42, %cst_21 [0] : vector<16x128xf32> to vector<128xf32>
    %44 = vector.shape_cast %43 : vector<128xf32> to vector<1x128xf32>
    %cst_22 = arith.constant 9.99999997E-7 : f32
    %45 = vector.broadcast %cst_22 : f32 to vector<1x128xf32>
    %46 = arith.addf %44, %45 : vector<1x128xf32>
    %cst_23 = arith.constant 9.99999997E-7 : f32
    %47 = vector.broadcast %cst_23 : f32 to vector<16x128xf32>
    %48 = arith.addf %7, %47 : vector<16x128xf32>
    %49 = vector.broadcast %41 : vector<1x128xf32> to vector<16x128xf32>
    %50 = arith.mulf %48, %49 : vector<16x128xf32>
    %cst_24 = arith.constant dense<0.000000e+00> : vector<16x128xf32>
    %51 = tpu.matmul %50, %0, %cst_24 {dimension_numbers = #tpu.dot_dimension_numbers<[1], [0], [0], [1], [0, 0, 1, 1], [], []>} : vector<16x128xf32>, vector<128x128xf32>, vector<16x128xf32> -> vector<16x128xf32>
    %cst_25 = arith.constant 9.99999997E-7 : f32
    %52 = vector.broadcast %cst_25 : f32 to vector<16x128xf32>
    %53 = arith.addf %14, %52 : vector<16x128xf32>
    %54 = vector.broadcast %46 : vector<1x128xf32> to vector<16x128xf32>
    %55 = arith.mulf %53, %54 : vector<16x128xf32>
    %cst_26 = arith.constant dense<0.000000e+00> : vector<16x128xf32>
    %56 = tpu.matmul %55, %0, %cst_26 {dimension_numbers = #tpu.dot_dimension_numbers<[1], [0], [0], [1], [0, 0, 1, 1], [], []>} : vector<16x128xf32>, vector<128x128xf32>, vector<16x128xf32> -> vector<16x128xf32>
    %cst_27 = arith.constant -1.000000e+00 : f32
    %cst_28 = arith.constant 1.000000e+00 : f32
    %57 = vector.broadcast %cst_27 : f32 to vector<16x128xf32>
    %58 = arith.maximumf %57, %56 : vector<16x128xf32>
    %59 = vector.broadcast %cst_28 : f32 to vector<16x128xf32>
    %60 = arith.minimumf %59, %58 : vector<16x128xf32>
    %cst_29 = arith.constant 1.000000e+00 : f32
    %61 = vector.broadcast %cst_29 : f32 to vector<16x128xf32>
    %62 = arith.mulf %51, %61 : vector<16x128xf32>
    %63 = arith.negf %62 : vector<16x128xf32>
    %64 = math.exp %63 : vector<16x128xf32>
    %cst_30 = arith.constant 1.000000e+00 : f32
    %65 = vector.broadcast %cst_30 : f32 to vector<16x128xf32>
    %66 = arith.addf %65, %64 : vector<16x128xf32>
    %67 = arith.divf %65, %66 : vector<16x128xf32>
    %cst_31 = arith.constant dense<0xFF800000> : vector<128xf32>
    %68 = vector.multi_reduction <maximumf>, %60, %cst_31 [0] : vector<16x128xf32> to vector<128xf32>
    %69 = vector.shape_cast %68 : vector<128xf32> to vector<1x128xf32>
    %70 = vector.broadcast %69 : vector<1x128xf32> to vector<16x128xf32>
    %71 = arith.subf %60, %70 : vector<16x128xf32>
    %72 = math.exp %71 : vector<16x128xf32>
    %cst_32 = arith.constant dense<0.000000e+00> : vector<128xf32>
    %73 = vector.multi_reduction <add>, %72, %cst_32 [0] : vector<16x128xf32> to vector<128xf32>
    %74 = vector.shape_cast %73 : vector<128xf32> to vector<1x128xf32>
    %75 = tpu.reciprocal %74 {approx = true} : vector<1x128xf32> -> vector<1x128xf32>
    %76 = vector.broadcast %75 : vector<1x128xf32> to vector<16x128xf32>
    %77 = arith.mulf %72, %76 : vector<16x128xf32>
    %cst_33 = arith.constant 1.600000e+01 : f32
    %78 = vector.broadcast %cst_33 : f32 to vector<16x128xf32>
    %79 = arith.mulf %77, %78 : vector<16x128xf32>
    %80 = arith.mulf %16, %79 : vector<16x128xf32>
    %cst_34 = arith.constant dense<0.000000e+00> : vector<128x128xf32>
    %81 = tpu.matmul %14, %80, %cst_34 {dimension_numbers = #tpu.dot_dimension_numbers<[0], [0], [1], [1], [0, 1, 1, 1], [], []>} : vector<16x128xf32>, vector<16x128xf32>, vector<128x128xf32> -> vector<128x128xf32>
    %82 = arith.mulf %81, %0 : vector<128x128xf32>
    %83 = arith.mulf %7, %30 : vector<16x128xf32>
    %cst_35 = arith.constant dense<0.000000e+00> : vector<16x128xf32>
    %84 = tpu.matmul %83, %82, %cst_35 {dimension_numbers = #tpu.dot_dimension_numbers<[1], [0], [0], [1], [0, 0, 1, 1], [], []>} : vector<16x128xf32>, vector<128x128xf32>, vector<16x128xf32> -> vector<16x128xf32>
    %85 = arith.mulf %84, %67 : vector<16x128xf32>
    %c0_36 = arith.constant 0 : index
    %c0_37 = arith.constant 0 : index
    %c0_38 = arith.constant 0 : index
    %86 = vector.load %arg5[%c0_36, %c0_37, %c0_38] : memref<1x16x128xf32, #tpu.memory_space<vmem>>, vector<1x16x128xf32>
    %87 = vector.shape_cast %86 : vector<1x16x128xf32> to vector<16x128xf32>
    %88 = vector.shape_cast %85 : vector<16x128xf32> to vector<1x16x128xf32>
    tpu.vector_store %arg5[%c0_36, %c0_37, %c0_38], %88 {strides = array<i32>} : memref<1x16x128xf32, #tpu.memory_space<vmem>>, vector<1x16x128xf32>,
    return
  }
  func.func @transform_0(%arg0: i32) -> (i32, i32) {
    %c0_i32 = arith.constant 0 : i32
    %c0_i32_0 = arith.constant 0 : i32
    %c0_i32_1 = arith.constant 0 : i32
    return %c0_i32, %c0_i32_0 : i32, i32
  }
  func.func @transform_1(%arg0: i32) -> (i32, i32, i32) {
    %c0_i32 = arith.constant 0 : i32
    %c0_i32_0 = arith.constant 0 : i32
    %c0_i32_1 = arith.constant 0 : i32
    return %arg0, %c0_i32, %c0_i32_0 : i32, i32, i32
  }
  func.func @transform_2(%arg0: i32) -> (i32, i32, i32) {
    %c0_i32 = arith.constant 0 : i32
    %c0_i32_0 = arith.constant 0 : i32
    %c0_i32_1 = arith.constant 0 : i32
    return %arg0, %c0_i32, %c0_i32_0 : i32, i32, i32
  }
  func.func @transform_3(%arg0: i32) -> (i32, i32, i32) {
    %c0_i32 = arith.constant 0 : i32
    %c0_i32_0 = arith.constant 0 : i32
    %c0_i32_1 = arith.constant 0 : i32
    return %arg0, %c0_i32, %c0_i32_0 : i32, i32, i32
  }
  func.func @transform_4(%arg0: i32) -> (i32, i32, i32) {
    %c0_i32 = arith.constant 0 : i32
    %c0_i32_0 = arith.constant 0 : i32
    %c0_i32_1 = arith.constant 0 : i32
    return %arg0, %c0_i32, %c0_i32_0 : i32, i32, i32
  }
}

</mosaic_0001>

<bundles_post_ra>
// kernel: tpu_custom_call.1
= control target key start
LH: loop header
LB: loop body
LE: loop exit
PB: predicated region body
PF: predicated region fallthrough
CT: control target
= control target key end

     0   :  { %s2594_s0 = inlined_call_operand.hbm [shape: f32[128,128], index: 0, kind: input, shape index: {}]   ;;  %s2595_s1 = inlined_call_operand.hbm [shape: f32[2,16,128], index: 1, kind: input, shape index: {}]   ;;  %s2596_s2 = inlined_call_operand.hbm [shape: f32[2,16,128], index: 2, kind: input, shape index: {}]   ;;  %s2597_s3 = inlined_call_operand.hbm [shape: f32[2,16,128], index: 3, kind: input, shape index: {}]   ;;  %s2598_s4 = inlined_call_operand.hbm [shape: f32[2,16,128], index: 4, kind: output, shape index: {}]  }
   0x1   :  { %2617 = sst [smem:[#allocation19_spill]] %s2595_s1 }
   0x2   :  { %2618 = sst [smem:[#allocation20_spill]] %s2596_s2 }
   0x3   :  { %9 = vsyncpa [#allocation3], 0 }
   0x4   :  { %10 = vsyncpa [#allocation6], 0 }
   0x5   :  { %12 = vsyncpa [#allocation6 + $0x1], 0 }
   0x6   :  { %13 = vsyncpa [#allocation9], 0 }
   0x7   :  { %15 = vsyncpa [#allocation9 + $0x1], 0 }
   0x8   :  { %16 = vsyncpa [#allocation4], 0 }
   0x9   :  { %18 = vsyncpa [#allocation4 + $0x1], 0  ;;  %s2077_s15 = smov 0   ;;  %s2079_s16 = smov 0  }
   0xa   :  { %s2081_s17 = smov 0   ;;  %s2083_s18 = smov 0  }
   0xb LB: > { %2619 = sst [smem:[#allocation15_spill]] %s2041_s18  ;;  %s2098_s19 = sadd.s32 1, %s2041_s18   ;;  %s2041_s18 = sphi %s2083_s18, %s2648_s18   ;;  %s2037_s17 = sphi %s2081_s17, %s2652_s17   ;;  %s2033_s16 = sphi %s2079_s16, %s2651_s16   ;;  %s2029_s15 = sphi %s2077_s15, %s2650_s15  }
   0xc   : > { %2620 = sst [smem:[#allocation16_spill]] %s2098_s19  ;;  %s52_s20 = sadd.s32 1, %s2037_s17 }
   0xd   : > { %s49_s21 = ssub.s32 %s2041_s18, %s2098_s19  ;;  %p2599_p0 = scmp.ne.s32.totalorder %s2037_s17, %s2033_s16 }
   0xe   : > { %p50_p1 = scmp.eq.s32.totalorder %s49_s21, 0  ;;  %p60_p2 = scmp.eq.s32.totalorder %s2041_s18, 0 }
   0xf   : > { %p1770_p5 = scmp.lt.s32.totalorder %s2041_s18, 2  ;;  %s180_s23 = sand.u32 1, %s2041_s18  }
  0x10   : > { %s2107_s22 = scalar_select %p50_p1, %s2037_s17, %s52_s20  }
  0x11   : > { %p61_p3 = por %p60_p2, %p2599_p0  ;;  %s2600_s24 = sand.u32 1, %s2037_s17  }
  0x12   : > { %2621 = sst [smem:[#allocation17_spill]] %s2107_s22  ;;  %s2118_s25 = sshll.u32 %s2600_s24, 4 }
  0x13   : > { %s2121_s26 = sshll.u32 %s2041_s18, 8  ;;  %s2622_s1 = sld [smem:[#allocation19_spill]] }
  0x14   : > { %s184_s30 = scalar_lea.vmem [#allocation5], %s2118_s25  ;;  %p2130_p6 = pnand %p1770_p5, %p61_p3 }
  0x15   : > { %s191_s5 = sshll.u32 %s184_s30, 4  ;;  %s2136_s7 = scalar_lea.sflag [#allocation6], %s180_s23  ;;  %s2134_s5 = int_to_ptr.vmem [resolvable:$true] %s191_s5 }
  0x16   : > { %s2623_s6 = scalar_select %p2130_p6, 1, 0 }
  0x17   : > { %p2142_p8 = pneg %p2130_p6 }
  0x19   : > { %s2127_s29 = scalar_lea.hbm %s2622_s1, %s2121_s26  ;;  %s1854_s12 = scalar_lea.hbm %s2622_s1, 512 }
  0x1a   : > { %s1849_s8 = scalar_lea.hbm %s2127_s29, 256  ;;  %p1855_p11 = scmp.lt.u32.totalorder %s2127_s29, %s2622_s1 }
  0x1b   : > { %p1850_p7 = scmp.ne.s32.totalorder %s2127_s29, %s1849_s8  ;;  %p1856_p12 = scmp.lt.u32.totalorder %s1854_s12, %s1849_s8 }
  0x1c   : > { %s2624_s9 = scalar_select %p2142_p8, 1, 0 }
  0x1d   : > { %p1852_p9 = pnand %p2142_p8, %p1850_p7  ;;  %p1857_p13 = por %p1856_p12, %p1855_p11 }
  0x1e   : > { %p1858_p1 = scmp.lt.u32.totalorder %s1849_s8, %s2127_s29 }
  0x1f   : > { %p1853_p10 = pneg %p1852_p9 }
  0x20   : > { %p1859_p2 = por %p1858_p1, %p1857_p13 }
  0x22   : > { %p1860_p3 = pnand %p1859_p2, %p1853_p10 }
  0x24   : > { %1863 = shalt.err (!%p1860_p3)
}
  0x25   : > { %s1864_s20 = scalar_lea.vmem %s2134_s5, 256  ;;  %s2043_s21 = smov [#allocation5]  }
  0x26   : > { %p1865_p5 = scmp.ne.s32.totalorder %s2134_s5, %s1864_s20  ;;  %s1869_s23 = sshll.u32 %s2043_s21, 4  ;;  %s1870_s23 = int_to_ptr.vmem [resolvable:$false] %s1869_s23 }
  0x27   : > { %s1871_s27 = scalar_lea.vmem %s1870_s23, 512  ;;  %p1872_p4 = scmp.lt.s32.totalorder %s2134_s5, %s1870_s23 }
  0x28   : > { %p1867_p7 = pnand %p1865_p5, %p2142_p8  ;;  %p1873_p0 = scmp.lt.s32.totalorder %s1871_s27, %s1864_s20 }
  0x2a   : > { %p1868_p9 = pneg %p1867_p7  ;;  %p1874_p11 = por %p1873_p0, %p1872_p4 }
  0x2c   : > { %p1875_p12 = pnand %p1874_p11, %p1868_p9 }
  0x2e   : > { %1878 = shalt.err (!%p1875_p12)
}
  0x2f   : > { %s2601_s28 = smov 128   ;;  %s2603_s30 = smov 8  }
  0x30   : > { %1758 = dma.hbm_to_vmem [thread:$0]  (!%p2130_p6), %s2127_s29, 256, %s2134_s5, %s2136_s7, %s2601_s28, %s2601_s28, %s2603_s30  }
  0x31   : > { %s2170_s8 = sadd.s32 4294967295, %s2041_s18   ;;  %s1212_s10 = sadd.s32 4294967294, %s2041_s18  }
  0x32   : > { %p65_p0 = scmp.ne.s32.totalorder %s2033_s16, %s2029_s15  ;;  %p2606_p4 = scmp.eq.s32.totalorder %s2170_s8, 0 }
  0x33   : > { %p141_p10 = scmp.eq.s32.totalorder %s2170_s8, 1  ;;  %p147_p13 = scmp.eq.s32.totalorder %s1212_s10, 1 }
  0x34   : > { %p2179_p1 = por %p2606_p4, %p65_p0  ;;  %p1213_p2 = scmp.ge.s32.totalorder %s2041_s18, 1 }
  0x35   : > { %p2626_p3 = scmp.ne.s32.totalorder %s2037_s17, %s2033_s16  ;;  %p2191_p7 = por %p147_p13, %p65_p0 }
  0x36   : > { %s2625_s11 = scalar_select %p2179_p1, 1, 0 }
  0x37   : > { %p2187_p5 = por %p141_p10, %p2626_p3  ;;  %p154_p9 = scmp.lt.s32.totalorder %s2041_s18, 3 }
  0x38   : > { %s2628_s5 = scalar_select %p2191_p7, 1, 0 }
  0x39   : > { %s2627_s29 = scalar_select %p2187_p5, 1, 0 }
  0x3a   : > { %2629 = sst [smem:[#allocation18_spill]] %s2628_s5  ;;  %p2196_p11 = pnand %p1213_p2, %p154_p9 }
  0x3b   : > { %s2046_s13 = smov [#allocation2]   ;;  %s2631_s2 = sld [smem:[#allocation20_spill]] }
  0x3c   : > { %s2630_s12 = scalar_select %p2196_p11, 1, 0 }
  0x3d   : > { %s166_s14 = sshll.u32 %s2046_s13, 4  ;;  %p1751_p12 = pneg %p2196_p11  ;;  %s2200_s14 = int_to_ptr.vmem [resolvable:$true] %s166_s14 }
  0x3e   : > { %s205_s27 = scalar_lea.vmem [#allocation7], %s2118_s25 }
  0x3f   : > { %s212_s10 = sshll.u32 %s205_s27, 4  ;;  %p2215_p0 = pnand %p1751_p12, %p2606_p4  ;;  %s2211_s10 = int_to_ptr.vmem [resolvable:$true] %s212_s10 }
  0x41   : > { %s2206_s23 = scalar_lea.hbm %s2631_s2, %s2121_s26  ;;  %s1884_s28 = scalar_lea.hbm %s2631_s2, 512 }
  0x42   : > { %s2632_s13 = scalar_select %p2215_p0, 1, 0 }
  0x43   : > { %s1879_s24 = scalar_lea.hbm %s2206_s23, 256  ;;  %p1885_p3 = scmp.lt.u32.totalorder %s2206_s23, %s2631_s2 }
  0x44   : > { %p1880_p10 = scmp.ne.s32.totalorder %s2206_s23, %s1879_s24  ;;  %p1886_p9 = scmp.lt.u32.totalorder %s1884_s28, %s1879_s24 }
  0x45   : > { %p1888_p5 = scmp.lt.u32.totalorder %s1879_s24, %s2206_s23 }
  0x46   : > { %p1882_p13 = pnand %p1880_p10, %p2142_p8  ;;  %p1887_p7 = por %p1886_p9, %p1885_p3 }
  0x48   : > { %p1883_p2 = pneg %p1882_p13  ;;  %p1889_p12 = por %p1888_p5, %p1887_p7 }
  0x4a   : > { %p1890_p4 = pnand %p1889_p12, %p1883_p2 }
  0x4c   : > { %1893 = shalt.err (!%p1890_p4)
}
  0x4d   : > { %s1894_s27 = scalar_lea.vmem %s2211_s10, 256  ;;  %s2047_s20 = smov [#allocation7]  }
  0x4e   : > { %p1895_p10 = scmp.ne.s32.totalorder %s2211_s10, %s1894_s27  ;;  %s1899_s21 = sshll.u32 %s2047_s20, 4  ;;  %s1900_s21 = int_to_ptr.vmem [resolvable:$false] %s1899_s21 }
  0x4f   : > { %s1901_s1 = scalar_lea.vmem %s1900_s21, 512  ;;  %p1902_p11 = scmp.lt.s32.totalorder %s2211_s10, %s1900_s21 }
  0x50   : > { %p1897_p13 = pnand %p1895_p10, %p2142_p8  ;;  %p1903_p0 = scmp.lt.s32.totalorder %s1901_s1, %s1894_s27 }
  0x52   : > { %p1898_p1 = pneg %p1897_p13  ;;  %p1904_p3 = por %p1903_p0, %p1902_p11 }
  0x54   : > { %p1905_p9 = pnand %p1904_p3, %p1898_p1 }
  0x56   : > { %1908 = shalt.err (!%p1905_p9)
}
  0x57   : > { %s2633_s24 = smov 8   ;;  %s2634_s28 = smov 128  }
  0x58   : > { %1761 = dma.hbm_to_vmem [thread:$0]  (!%p2130_p6), %s2206_s23, 256, %s2211_s10, %s2136_s7, %s2634_s28, %s2634_s28, %s2633_s24  }
  0x59   : > { %s2248_s2 = scalar_lea.hbm %s2597_s3, %s2121_s26  ;;  %s1909_s1 = scalar_lea.hbm %s2594_s0, 2048 }
  0x5a   : > { %p1910_p4 = scmp.ne.s32.totalorder %s2594_s0, %s1909_s1  ;;  %p2635_p1 = scmp.ne.s32.totalorder %s2632_s13, 0 }
  0x5b   : > { %p1916_p0 = scmp.lt.u32.totalorder %s1909_s1, %s2594_s0 }
  0x5c   : > { %p1911_p5 = pneg %p2635_p1 }
  0x5e   : > { %p1912_p7 = pnand %p1911_p5, %p1910_p4 }
  0x60   : > { %p1913_p11 = pneg %p1912_p7 }
  0x62   : > { %p1918_p2 = pnand %p1916_p0, %p1913_p11 }
  0x64   : > { %1921 = shalt.err (!%p1918_p2)
}
  0x65   : > { %s1922_s26 = scalar_lea.vmem %s2200_s14, 2048  ;;  %p1930_p3 = scmp.lt.s32.totalorder %s2200_s14, %s2200_s14 }
  0x66   : > { %p1923_p12 = scmp.ne.s32.totalorder %s2200_s14, %s1922_s26  ;;  %p1931_p9 = scmp.lt.s32.totalorder %s1922_s26, %s1922_s26 }
  0x68   : > { %p1925_p10 = pnand %p1923_p12, %p1911_p5  ;;  %p1932_p6 = por %p1931_p9, %p1930_p3 }
  0x6a   : > { %p1926_p13 = pneg %p1925_p10 }
  0x6c   : > { %p1933_p8 = pnand %p1932_p6, %p1926_p13 }
  0x6e   : > { %1936 = shalt.err (!%p1933_p8)
}
  0x6f   : > { %1754 = dma.hbm_to_vmem [thread:$0]  (!%p2635_p1), %s2594_s0, 2048, %s2200_s14, [#allocation3], %s2634_s28, %s2634_s28, %s2633_s24  }
  0x70   : > { %s226_s22 = scalar_lea.vmem [#allocation8], %s2118_s25  ;;  %s2636_s5 = sand.u32 1, %s2037_s17  }
  0x71   : > { %s233_s7 = sshll.u32 %s226_s22, 4  ;;  %s2279_s23 = scalar_lea.sflag [#allocation9], %s2636_s5  ;;  %s2275_s7 = int_to_ptr.vmem [resolvable:$true] %s233_s7 }
  0x72   : > { %s1937_s10 = scalar_lea.hbm %s2248_s2, 256  ;;  %p2637_p8 = scmp.ne.s32.totalorder %s2624_s9, 0 }
  0x73   : > { %p1938_p6 = scmp.ne.s32.totalorder %s2248_s2, %s1937_s10  ;;  %s1942_s20 = scalar_lea.hbm %s2597_s3, 512 }
  0x74   : > { %p1943_p1 = scmp.lt.u32.totalorder %s2248_s2, %s2597_s3  ;;  %p1944_p7 = scmp.lt.u32.totalorder %s1942_s20, %s1937_s10 }
  0x75   : > { %p1940_p4 = pnand %p1938_p6, %p2637_p8  ;;  %p1946_p0 = scmp.lt.u32.totalorder %s1937_s10, %s2248_s2 }
  0x76   : > { %p1945_p11 = por %p1944_p7, %p1943_p1 }
  0x77   : > { %p1941_p5 = pneg %p1940_p4 }
  0x78   : > { %p1947_p2 = por %p1946_p0, %p1945_p11 }
  0x7a   : > { %p1948_p12 = pnand %p1947_p2, %p1941_p5 }
  0x7c   : > { %1951 = shalt.err (!%p1948_p12)
}
  0x7d   : > { %s1952_s25 = scalar_lea.vmem %s2275_s7, 256  ;;  %s2048_s14 = smov [#allocation8]  }
  0x7e   : > { %p1953_p10 = scmp.ne.s32.totalorder %s2275_s7, %s1952_s25  ;;  %s1957_s1 = sshll.u32 %s2048_s14, 4  ;;  %s1958_s1 = int_to_ptr.vmem [resolvable:$false] %s1957_s1 }
  0x7f   : > { %s1959_s26 = scalar_lea.vmem %s1958_s1, 512  ;;  %p1960_p9 = scmp.lt.s32.totalorder %s2275_s7, %s1958_s1 }
  0x80   : > { %p1955_p13 = pnand %p1953_p10, %p2637_p8  ;;  %p1961_p6 = scmp.lt.s32.totalorder %s1959_s26, %s1952_s25 }
  0x82   : > { %p1956_p3 = pneg %p1955_p13  ;;  %p1962_p4 = por %p1961_p6, %p1960_p9 }
  0x84   : > { %p1963_p1 = pnand %p1962_p4, %p1956_p3 }
  0x86   : > { %1966 = shalt.err (!%p1963_p1)
}
  0x87   : > { %p2638_p5 = scmp.ne.s32.totalorder %s2623_s6, 0  ;;  %p2639_p8 = scmp.ne.s32.totalorder %s2630_s12, 0 }
  0x88   : > { %p2640_p7 = scmp.eq.s32.totalorder (!%p2639_p8), %s2170_s8, 0 }
  0x89   : > { %1764 = dma.hbm_to_vmem [thread:$0]  (!%p2638_p5), %s2248_s2, 256, %s2275_s7, %s2279_s23, %s2634_s28, %s2634_s28, %s2633_s24  }
  0x8a   : > { %245 = sbr.rel (%p2639_p8) target bundleno = 1211 (0x4bb), region = 36 }
  0x91   : > { %2012 = dma.done.wait (%p2640_p7), [#allocation3], 2048   ;;  %p2641_p11 = pmov %p2640_p7 }
  0x92   : > { %s251_s6 = sand.u32 1, %s2170_s8   ;;  %s2314_s9 = sand.u32 1, %s2033_s16  }
  0x93   : > { %2014 = vsyncadd (%p2641_p11), [#allocation3], 4294965248  ;;  %s2317_s18 = sshll.u32 %s2314_s9, 4  ;;  %s252_s2 = scalar_lea.sflag [#allocation6], %s251_s6 }
  0x94   : > { %s255_s24 = scalar_lea.vmem [#allocation5], %s2317_s18  ;;  %p2642_p0 = scmp.ne.s32.totalorder %s2625_s11, 0 }
  0x96   : > { %2016 = dma.done.wait (%p2642_p0), %s252_s2, 512  }
  0x97   : > { %2018 = vsyncadd (%p2642_p0), %s252_s2, 4294966784  ;;  %s264_s12 = scalar_lea.vmem [#allocation7], %s2317_s18  ;;  %s270_s28 = scalar_lea.sflag [#allocation9], %s2314_s9 }
  0x98   : > { %s273_s19 = scalar_lea.vmem [#allocation8], %s2317_s18 }
  0x99   : > { %2020 = dma.done.wait (%p2642_p0), %s270_s28, 256  }
  0x9a   : > { %2022 = vsyncadd (%p2642_p0), %s270_s28, 4294967040  ;;  %v2331_v0 = vld [vmem:[#allocation2] sm:$0xff]  ;;  %v2333_v1 = vld [vmem:[#allocation2 + $0x8] sm:$0xff]  ;;  %vm781_vm0 = vcmask 130048   ;;  %s307_s11 = scalar_lea.vmem [#allocation10], %s2317_s18  ;;  %s1263_s7 = sshll.u32 %s2170_s8, 8 }
  0x9b   : > { %v2335_v2 = vld [vmem:[#allocation2 + $0x10] sm:$0xff]  ;;  %v2339_v3 = vpack.c.bf16 %v2333_v1, %v2331_v0  ;;  %v2341_v4 = vld [vmem:[#allocation2 + $0x18] sm:$0xff]  ;;  %v2347_v6 = vld [vmem:[#allocation2 + $0x20] sm:$0xff]  ;;  %s1084_s22 = sshll.u32 %s307_s11, 4  ;;  %s2550_s10 = scalar_lea.hbm %s2598_s4, %s1263_s7  ;;  %s2545_s22 = int_to_ptr.vmem [resolvable:$true] %s1084_s22 }
  0x9c   : > { %v2345_v5 = vpack.c.bf16 %v2341_v4, %v2335_v2  ;;  %v2349_v7 = vld [vmem:[#allocation2 + $0x28] sm:$0xff]  ;;  %v2354_v8 = vld [vmem:[#allocation2 + $0x30] sm:$0xff]  ;;  %v2362_v10 = vld [vmem:[#allocation2 + $0x38] sm:$0xff]  ;;  %s1071_s13 = scalar_lea.sflag [#allocation4], %s2314_s9  ;;  %s1967_s8 = scalar_lea.vmem %s2545_s22, 256 }
  0x9d   : > { %1576 = vmatprep.subr.bf16.mxu0 %v2339_v3  ;;  %1608 = vmatprep.subr.bf16.mxu1 %v2339_v3  ;;  %v2360_v9 = vpack.c.bf16 %v2349_v7, %v2347_v6  ;;  %v324_v11 = vld [vmem:[%s255_s24] sm:$0xff]  ;;  %v339_v14 = vld [vmem:[%s264_s12 + $0x8] sm:$0xff]  ;;  %v2370_v19 = vpack.c.bf16 %v2362_v10, %v2354_v8  ;;  %p1968_p2 = scmp.ne.s32.totalorder %s2545_s22, %s1967_s8  ;;  %p2643_p12 = scmp.ne.s32.totalorder %s2627_s29, 0 }
  0x9e   : > { %1578 = vmatpush3.bf16.msra.mxu0 %v2339_v3  ;;  %1610 = vmatpush3.bf16.msra.mxu1 %v2339_v3  ;;  %v338_v12 = vld [vmem:[%s264_s12] sm:$0xff]  ;;  %v1231_v13 = vmul.f32 -1.442695, %v324_v11  ;;  %v325_v16 = vld [vmem:[%s255_s24 + $0x8] sm:$0xff]  ;;  %v1234_v17 = vmul.f32 -1.442695, %v339_v14 }
  0x9f   : > { %1580 = vmatprep.subr.bf16.mxu0 %v2345_v5  ;;  %1612 = vmatprep.subr.bf16.mxu1 %v2345_v5  ;;  %v1233_v15 = vmul.f32 -1.442695, %v338_v12  ;;  %v1232_v18 = vmul.f32 -1.442695, %v325_v16  ;;  %v2373_v20 = vld [vmem:[#allocation2 + $0x40] sm:$0xff]  ;;  %v2375_v21 = vld [vmem:[#allocation2 + $0x48] sm:$0xff]  ;;  %p1969_p10 = pnand %p1968_p2, %p2643_p12 }
  0xa0   : > { %1811 = vpow2.f32 %v1231_v13  ;;  %v2382_v22 = vpack.c.bf16 %v2375_v21, %v2373_v20  ;;  %v2385_v23 = vld [vmem:[#allocation2 + $0x50] sm:$0xff]  ;;  %v2387_v24 = vld [vmem:[#allocation2 + $0x58] sm:$0xff]  ;;  %v2397_v27 = vld [vmem:[#allocation2 + $0x60] sm:$0xff]  ;;  %s2049_s30 = smov [#allocation10]  }
  0xa1   : > { %1813 = vpow2.f32 %v1233_v15  ;;  %v2394_v25 = vpack.c.bf16 %v2387_v24, %v2385_v23  ;;  %v2399_v28 = vld [vmem:[#allocation2 + $0x68] sm:$0xff]  ;;  %v2409_v36 = vld [vmem:[#allocation2 + $0x70] sm:$0xff]  ;;  %v2411_v37 = vld [vmem:[#allocation2 + $0x78] sm:$0xff]  ;;  %p1970_p13 = pneg %p1969_p10  ;;  %s1971_s20 = sshll.u32 %s2049_s30, 4  ;;  %s1972_s20 = int_to_ptr.vmem [resolvable:$false] %s1971_s20 }
  0xa2   : > { %1582 = vmatpush3.bf16.msra.mxu0 %v2345_v5  ;;  %1614 = vmatpush3.bf16.msra.mxu1 %v2345_v5  ;;  %1815 = vpow2.f32 %v1234_v17  ;;  %v2406_v34 = vpack.c.bf16 %v2399_v28, %v2397_v27  ;;  %v2418_v39 = vpack.c.bf16 %v2411_v37, %v2409_v36  ;;  %s1973_s27 = scalar_lea.vmem %s1972_s20, 512  ;;  %p1974_p3 = scmp.lt.s32.totalorder %s2545_s22, %s1972_s20 }
  0xa3   : > { %1584 = vmatprep.subr.bf16.mxu0 %v2360_v9  ;;  %1616 = vmatprep.subr.bf16.mxu1 %v2360_v9  ;;  %1817 = vpow2.f32 %v1232_v18  ;;  %p1975_p9 = scmp.lt.s32.totalorder %s1973_s27, %s1967_s8 }
  0xa5   : > { %p1976_p6 = por %p1975_p9, %p1974_p3 }
  0xa6   : > { %1586 = vmatpush3.bf16.msra.mxu0 %v2360_v9  ;;  %1618 = vmatpush3.bf16.msra.mxu1 %v2360_v9 }
  0xa7   : > { %1588 = vmatprep.subr.bf16.mxu0 %v2370_v19  ;;  %1620 = vmatprep.subr.bf16.mxu1 %v2370_v19  ;;  %p1977_p4 = pnand %p1976_p6, %p1970_p13 }
  0xaa   : > { %1590 = vmatpush3.bf16.msra.mxu0 %v2370_v19  ;;  %1622 = vmatpush3.bf16.msra.mxu1 %v2370_v19  ;;  %v1812_v26 = vpop.eup %1811 }
  0xab   : > { %1592 = vmatprep.subr.bf16.mxu0 %v2382_v22  ;;  %1624 = vmatprep.subr.bf16.mxu1 %v2382_v22  ;;  %v1814_v29 = vpop.eup %1813  ;;  %v332_v30 = vadd.f32 1.0, %v1812_v26 }
  0xac   : > { %v1816_v31 = vpop.eup %1815  ;;  %v346_v32 = vadd.f32 1.0, %v1814_v29 }
  0xad   : > { %v1818_v33 = vpop.eup %1817  ;;  %1819 = vrcp.f32 %v332_v30  ;;  %v347_v35 = vadd.f32 1.0, %v1816_v31 }
  0xae   : > { %1594 = vmatpush3.bf16.msra.mxu0 %v2382_v22  ;;  %1626 = vmatpush3.bf16.msra.mxu1 %v2382_v22  ;;  %1821 = vrcp.f32 %v346_v32  ;;  %v333_v38 = vadd.f32 1.0, %v1818_v33 }
  0xaf   : > { %1596 = vmatprep.subr.bf16.mxu0 %v2394_v25  ;;  %1628 = vmatprep.subr.bf16.mxu1 %v2394_v25  ;;  %1823 = vrcp.f32 %v347_v35 }
  0xb0   : > { %1825 = vrcp.f32 %v333_v38 }
  0xb2   : > { %1598 = vmatpush3.bf16.msra.mxu0 %v2394_v25  ;;  %1630 = vmatpush3.bf16.msra.mxu1 %v2394_v25 }
  0xb3   : > { %1600 = vmatprep.subr.bf16.mxu0 %v2406_v34  ;;  %1632 = vmatprep.subr.bf16.mxu1 %v2406_v34 }
  0xb6   : > { %1602 = vmatpush3.bf16.msra.mxu0 %v2406_v34  ;;  %1634 = vmatpush3.bf16.msra.mxu1 %v2406_v34 }
  0xb7   : > { %1604 = vmatprep.subr.bf16.mxu0 %v2418_v39  ;;  %1636 = vmatprep.subr.bf16.mxu1 %v2418_v39  ;;  %v2425_v40 = vpop.eup %1819 }
  0xb8   : > { %v2427_v41 = vpop.eup %1821  ;;  %v2444_v57 = vadd.f32 1e-06, %v2425_v40 }
  0xb9   : > { %v2431_v42 = vpop.eup %1823  ;;  %749 = vxpose.xlu0.b32.start [1/2] (short) %v2427_v41, 128  ;;  %v2450_v60 = vadd.f32 1e-06, %v2427_v41 }
  0xba   : > { %1606 = vmatpush3.bf16.msra.mxu0 %v2418_v39  ;;  %1638 = vmatpush3.bf16.msra.mxu1 %v2418_v39  ;;  %v2435_v43 = vpop.eup %1825  ;;  %v354_v44 = vadd.f32 %v2431_v42, %v2427_v41  ;;  %v2453_v61 = vadd.f32 1e-06, %v2431_v42 }
  0xbb   : > { %1672 = vmatprep.subr.bf16.mxu1 %v2339_v3  ;;  %1640 = vmatprep.subr.bf16.mxu0 %v2339_v3  ;;  %v362_v45 = vadd.f32 %v2435_v43, %v2425_v40  ;;  %v2447_v58 = vadd.f32 1e-06, %v2435_v43 }
  0xbc   : > { %v355_v46 = vrot.slane %v354_v44, 4 }
  0xbd   : > { %v363_v47 = vrot.slane %v362_v45, 4  ;;  %750 = vxpose.xlu0.b32.end [2/2] (short) %v2431_v42, 128 }
  0xbe   : > { %v356_v48 = vadd.f32 %v355_v46, %v354_v44 }
  0xbf   : > { %v364_v49 = vadd.f32 %v363_v47, %v362_v45 }
  0xc0   : > { %v357_v50 = vrot.slane %v356_v48, 2 }
  0xc1   : > { %v365_v51 = vrot.slane %v364_v49, 2 }
  0xc2   : > { %v358_v52 = vadd.f32 %v357_v50, %v356_v48 }
  0xc3   : > { %v366_v53 = vadd.f32 %v365_v51, %v364_v49 }
  0xc4   : > { %v359_v54 = vrot.slane %v358_v52, 1 }
  0xc5   : > { %v367_v55 = vrot.slane %v366_v53, 1 }
  0xc6   : > { %v360_v56 = vadd.f32 %v359_v54, %v358_v52 }
  0xc7   : > { %v368_v59 = vadd.f32 %v367_v55, %v366_v53 }
  0xc8   : > { %v361_v62 = vadd.f32 1e-06, %v360_v56 }
  0xc9   : > { %v369_v63 = vadd.f32 1e-06, %v368_v59 }
  0xca   : > { %v372_v11 = vmul.f32 %v2444_v57, %v361_v62  ;;  %v373_v12 = vmul.f32 %v2447_v58, %v361_v62 }
  0xcb   : > { %v453_v13 = vmul.f32 %v2450_v60, %v369_v63  ;;  %v454_v14 = vmul.f32 %v2453_v61, %v369_v63 }
  0xcc   : > { %1404 = vmatprep.mubr.f32.mxu0 %v372_v11 }
  0xcd   : > { %1405 = vmatmul.mubr.f32.vlgmr.msra.gmra.mrb[0].mxu0 %v373_v12  ;;  %1439 = vmatprep.mubr.f32.mxu1 %v453_v13 }
  0xce   : > { %1440 = vmatmul.mubr.f32.vlgmr.msra.gmra.mrb[0].mxu1 %v454_v14  ;;  %1642 = vmatpush3.bf16.msra.mxu0 %v2339_v3 }
  0xcf   : > { %1674 = vmatpush3.bf16.msra.mxu1 %v2339_v3  ;;  %1644 = vmatprep.subr.bf16.mxu0 %v2345_v5 }
  0xd0   : > { %1676 = vmatprep.subr.bf16.mxu1 %v2345_v5 }
  0xd2   : > { %1646 = vmatpush3.bf16.msra.mxu0 %v2345_v5 }
  0xd3   : > { %1678 = vmatpush3.bf16.msra.mxu1 %v2345_v5  ;;  %1648 = vmatprep.subr.bf16.mxu0 %v2360_v9 }
  0xd4   : > { %1680 = vmatprep.subr.bf16.mxu1 %v2360_v9 }
  0xd6   : > { %1650 = vmatpush3.bf16.msra.mxu0 %v2360_v9 }
  0xd7   : > { %1682 = vmatpush3.bf16.msra.mxu1 %v2360_v9  ;;  %1652 = vmatprep.subr.bf16.mxu0 %v2370_v19 }
  0xd8   : > { %1684 = vmatprep.subr.bf16.mxu1 %v2370_v19 }
  0xda   : > { %1654 = vmatpush3.bf16.msra.mxu0 %v2370_v19 }
  0xdb   : > { %1686 = vmatpush3.bf16.msra.mxu1 %v2370_v19  ;;  %1656 = vmatprep.subr.bf16.mxu0 %v2382_v22 }
  0xdc   : > { %1688 = vmatprep.subr.bf16.mxu1 %v2382_v22 }
  0xde   : > { %1658 = vmatpush3.bf16.msra.mxu0 %v2382_v22 }
  0xdf   : > { %1690 = vmatpush3.bf16.msra.mxu1 %v2382_v22  ;;  %1660 = vmatprep.subr.bf16.mxu0 %v2394_v25 }
  0xe0   : > { %1692 = vmatprep.subr.bf16.mxu1 %v2394_v25 }
  0xe2   : > { %1662 = vmatpush3.bf16.msra.mxu0 %v2394_v25 }
  0xe3   : > { %1694 = vmatpush3.bf16.msra.mxu1 %v2394_v25  ;;  %1664 = vmatprep.subr.bf16.mxu0 %v2406_v34 }
  0xe4   : > { %1696 = vmatprep.subr.bf16.mxu1 %v2406_v34 }
  0xe6   : > { %1666 = vmatpush3.bf16.msra.mxu0 %v2406_v34 }
  0xe7   : > { %1698 = vmatpush3.bf16.msra.mxu1 %v2406_v34  ;;  %1668 = vmatprep.subr.bf16.mxu0 %v2418_v39 }
  0xe8   : > { %1700 = vmatprep.subr.bf16.mxu1 %v2418_v39 }
  0xea   : > { %1670 = vmatpush3.bf16.msra.mxu0 %v2418_v39 }
  0xeb   : > { %1702 = vmatpush3.bf16.msra.mxu1 %v2418_v39 }
 0x139   : > { %v765_v52 = vpop.trf.xlu0 }
 0x13d   : > { %v766_v11 = vpop.trf.xlu0 }
 0x1a0   : > { %v1406_v3 = vpop.f32.mrb[0].mxu0 }
 0x1a1   : > { %1827 = vrcp.f32 %v1406_v3  ;;  %v440_v5 = vpop.f32.mrb[1].mxu0  ;;  %v1441_v9 = vpop.f32.mrb[0].mxu1 }
 0x1a2   : > { %1829 = vrcp.f32 %v440_v5  ;;  %v521_v15 = vpop.f32.mrb[1].mxu1  ;;  %v767_v5 = vpop.trf.xlu0 }
 0x1a3   : > { %1831 = vrcp.f32 %v1441_v9 }
 0x1a4   : > { %1833 = vrcp.f32 %v521_v15 }
 0x1ab   : > { %v1828_v16 = vpop.eup %1827 }
 0x1ac   : > { %v1830_v17 = vpop.eup %1829  ;;  %v2490_v18 = vmul.f32 %v1828_v16, %v2435_v43  ;;  %v768_v16 = vpop.trf.xlu0 }
 0x1ad   : > { %v1832_v19 = vpop.eup %1831  ;;  %v542_v22 = vmul.f32 %v1830_v17, %v2425_v40 }
 0x1ae   : > { %v1834_v25 = vpop.eup %1833  ;;  %v533_v26 = vmul.f32 %v1832_v19, %v2431_v42 }
 0x1af   : > { %v544_v29 = vadd.f32 %v2490_v18, %v542_v22  ;;  %v532_v30 = vmul.f32 %v1834_v25, %v2427_v41 }
 0x1b0   : > { %v769_v17 = vpop.trf.xlu0 }
 0x1b1   : > { %v545_v31 = vrot.slane %v544_v29, 4  ;;  %v534_v32 = vadd.f32 %v533_v26, %v532_v30 }
 0x1b3   : > { %v546_v33 = vadd.f32 %v545_v31, %v544_v29  ;;  %v535_v34 = vrot.slane %v534_v32, 4 }
 0x1b4   : > { %v770_v29 = vpop.trf.xlu0 }
 0x1b5   : > { %v547_v35 = vrot.slane %v546_v33, 2  ;;  %v536_v38 = vadd.f32 %v535_v34, %v534_v32 }
 0x1b7   : > { %v548_v39 = vadd.f32 %v547_v35, %v546_v33  ;;  %v537_v44 = vrot.slane %v536_v38, 2 }
 0x1b8   : > { %v771_v33 = vpop.trf.xlu0 }
 0x1b9   : > { %v549_v43 = vrot.slane %v548_v39, 1  ;;  %v538_v45 = vadd.f32 %v537_v44, %v536_v38 }
 0x1bb   : > { %v550_v46 = vadd.f32 %v549_v43, %v548_v39  ;;  %v539_v47 = vrot.slane %v538_v45, 1 }
 0x1bc   : > { %v772_v38 = vpop.trf.xlu0 }
 0x1bd   : > { %v551_v40 = vadd.f32 1e-06, %v550_v46  ;;  %v540_v48 = vadd.f32 %v539_v47, %v538_v45  ;;  %v352_v46 = vld [vmem:[%s273_s19] sm:$0xff]  ;;  %v353_v47 = vld [vmem:[%s273_s19 + $0x8] sm:$0xff] }
 0x1bf   : > { %v629_v42 = vmul.f32 %v551_v40, %v2450_v60  ;;  %v630_v49 = vmul.f32 %v551_v40, %v2453_v61  ;;  %v541_v50 = vadd.f32 1e-06, %v540_v48 }
 0x1c0   : > { %v773_v39 = vpop.trf.xlu0 }
 0x1c1   : > { %1509 = vmatprep.mubr.f32.mxu1 %v629_v42  ;;  %v552_v41 = vmul.f32 %v541_v50, %v2444_v57  ;;  %v553_v51 = vmul.f32 %v541_v50, %v2447_v58 }
 0x1c2   : > { %1510 = vmatmul.mubr.f32.vlgmr.msra.gmra.mrb[2].mxu1 %v630_v49 }
 0x1c3   : > { %1572 = vmatprep.mubr.f32.mxu1 %v542_v22  ;;  %1474 = vmatprep.mubr.f32.mxu0 %v552_v41 }
 0x1c4   : > { %1475 = vmatmul.mubr.f32.vlgmr.msra.gmra.mrb[2].mxu0 %v553_v51  ;;  %v774_v40 = vpop.trf.xlu0 }
 0x1c5   : > { %1516 = vmatprep.mubr.msk.f32.mxu0 %vm781_vm0, %v765_v52 }
 0x1c8   : > { %v775_v51 = vpop.trf.xlu0 }
 0x1cc   : > { %v776_v52 = vpop.trf.xlu0 }
 0x295   : > { %v1511_v53 = vpop.f32.mrb[2].mxu1 }
 0x296   : > { %v1236_v54 = vclamps-f32 %v1511_v53, 1.0  ;;  %v697_v55 = vpop.f32.mrb[3].mxu1  ;;  %v777_v53 = vpop.trf.xlu0 }
 0x297   : > { %v1235_v56 = vclamps-f32 %v697_v55, 1.0  ;;  %v2501_v59 = vpop.f32.mrb[2].mxu0 }
 0x298   : > { %v2503_v60 = vpop.f32.mrb[3].mxu0 }
 0x299   : > { %v722_v61 = vmax.f32 %v1235_v56, %v1236_v54 }
 0x29b   : > { %v723_v57 = vrot.slane %v722_v61, 4 }
 0x29d   : > { %v724_v62 = vmax.f32 %v722_v61, %v723_v57 }
 0x29f   : > { %v725_v58 = vrot.slane %v724_v62, 2 }
 0x2a1   : > { %v726_v63 = vmax.f32 %v724_v62, %v725_v58 }
 0x2a3   : > { %v727_v12 = vrot.slane %v726_v63, 1 }
 0x2a5   : > { %v728_v13 = vmax.f32 %v726_v63, %v727_v12 }
 0x2a7   : > { %v729_v14 = vsub.f32 %v1235_v56, %v728_v13  ;;  %v730_v3 = vsub.f32 %v1236_v54, %v728_v13  ;;  %v778_v54 = vpop.trf.xlu0 }
 0x2a9   : > { %v731_v9 = vmul.f32 1.442695, %v729_v14  ;;  %v733_v15 = vmul.f32 1.442695, %v730_v3 }
 0x2ab   : > { %1835 = vpow2.f32 %v731_v9  ;;  %v779_v55 = vpop.trf.xlu0 }
 0x2ac   : > { %1837 = vpow2.f32 %v733_v15 }
 0x2af   : > { %v780_v56 = vpop.trf.xlu0 }
 0x2b5   : > { %v1836_v19 = vpop.eup %1835 }
 0x2b6   : > { %v1838_v22 = vpop.eup %1837 }
 0x2b7   : > { %v735_v25 = vadd.f32 %v1838_v22, %v1836_v19 }
 0x2b9   : > { %v736_v26 = vrot.slane %v735_v25, 4 }
 0x2bb   : > { %v737_v30 = vadd.f32 %v736_v26, %v735_v25 }
 0x2bd   : > { %v738_v31 = vrot.slane %v737_v30, 2 }
 0x2bf   : > { %v739_v32 = vadd.f32 %v738_v31, %v737_v30 }
 0x2c1   : > { %v740_v34 = vrot.slane %v739_v32, 1 }
 0x2c3   : > { %v741_v35 = vadd.f32 %v740_v34, %v739_v32 }
 0x2c5   : > { %1839 = vrcp.f32 %v741_v35 }
 0x2cf   : > { %v1840_v44 = vpop.eup %1839 }
 0x2d0   : > { %v743_v43 = vmul.f32 %v1840_v44, %v1836_v19  ;;  %v744_v45 = vmul.f32 %v1840_v44, %v1838_v22 }
 0x2d2   : > { %v745_v48 = vmul.f32 16.0, %v743_v43  ;;  %v746_v42 = vmul.f32 16.0, %v744_v45 }
 0x2d4   : > { %v747_v49 = vmul.f32 %v745_v48, %v352_v46  ;;  %v748_v50 = vmul.f32 %v746_v42, %v353_v47 }
 0x2d6   : > { %v1703_v41 = vpack.c.bf16 %v748_v50, %v747_v49 }
 0x2d8   : > { %1704 = vmatprep.subr.bf16.mxu0 %v1703_v41 }
 0x2d9   : > { %1706 = vmatpush3.bf16.msra.mxu0 %v1703_v41 }
 0x2dc   : > { %1517 = vmatmul.mubr.msk.f32.vlgmr.msra.gmra.mrb[4].mxu0 %vm781_vm0, %v766_v11 }
 0x2dd   : > { %1519 = vmatprep.mubr.msk.f32.mxu0 %vm781_vm0, %v767_v5 }
 0x2e0   : > { %1520 = vmatmul.mubr.msk.f32.gmra.mrb[6].mxu0 %vm781_vm0, %v768_v16 }
 0x2e1   : > { %1522 = vmatprep.mubr.msk.f32.mxu0 %vm781_vm0, %v769_v17 }
 0x2e4   : > { %1523 = vmatmul.mubr.msk.f32.gmra.mrb[8].mxu0 %vm781_vm0, %v770_v29 }
 0x2e5   : > { %1525 = vmatprep.mubr.msk.f32.mxu0 %vm781_vm0, %v771_v33 }
 0x2e8   : > { %1526 = vmatmul.mubr.msk.f32.gmra.mrb[10].mxu0 %vm781_vm0, %v772_v38 }
 0x2e9   : > { %1528 = vmatprep.mubr.msk.f32.mxu0 %vm781_vm0, %v773_v39 }
 0x2ec   : > { %1529 = vmatmul.mubr.msk.f32.gmra.mrb[12].mxu0 %vm781_vm0, %v774_v40 }
 0x2ed   : > { %1531 = vmatprep.mubr.msk.f32.mxu0 %vm781_vm0, %v775_v51 }
 0x2f0   : > { %1532 = vmatmul.mubr.msk.f32.gmra.mrb[14].mxu0 %vm781_vm0, %v776_v52 }
 0x2f1   : > { %1534 = vmatprep.mubr.msk.f32.mxu0 %vm781_vm0, %v777_v53 }
 0x2f4   : > { %1535 = vmatmul.mubr.msk.f32.gmra.mrb[16].mxu0 %vm781_vm0, %v778_v54 }
 0x2f5   : > { %1537 = vmatprep.mubr.msk.f32.mxu0 %vm781_vm0, %v779_v55 }
 0x2f8   : > { %1538 = vmatmul.mubr.msk.f32.gmra.mrb[18].mxu0 %vm781_vm0, %v780_v56 }
 0x3af   : > { %v1518_v61 = vpop.f32.mrb[4].mxu0 }
 0x3b0   : > { %v976_v57 = vmul.f32 %v1518_v61, %v2333_v1  ;;  %v896_v62 = vpop.f32.mrb[5].mxu0 }
 0x3b1   : > { %v975_v58 = vmul.f32 %v896_v62, %v2331_v0 }
 0x3b3   : > { %v1707_v63 = vpack.c.bf16 %v976_v57, %v975_v58  ;;  %v1521_v11 = vpop.f32.mrb[6].mxu0 }
 0x3b4   : > { %v978_v12 = vmul.f32 %v1521_v11, %v2341_v4  ;;  %v906_v13 = vpop.f32.mrb[7].mxu0 }
 0x3b5   : > { %v977_v14 = vmul.f32 %v906_v13, %v2335_v2  ;;  %1708 = vmatprep.subr.bf16.mxu1 %v1707_v63 }
 0x3b6   : > { %1710 = vmatpush3.bf16.msra.mxu1 %v1707_v63 }
 0x3b7   : > { %v1711_v3 = vpack.c.bf16 %v978_v12, %v977_v14  ;;  %v1524_v5 = vpop.f32.mrb[8].mxu0 }
 0x3b8   : > { %v980_v9 = vmul.f32 %v1524_v5, %v2349_v7  ;;  %v916_v15 = vpop.f32.mrb[9].mxu0 }
 0x3b9   : > { %v979_v16 = vmul.f32 %v916_v15, %v2347_v6  ;;  %1712 = vmatprep.subr.bf16.mxu1 %v1711_v3 }
 0x3ba   : > { %1714 = vmatpush3.bf16.msra.mxu1 %v1711_v3 }
 0x3bb   : > { %v1715_v1 = vpack.c.bf16 %v980_v9, %v979_v16  ;;  %v1527_v0 = vpop.f32.mrb[10].mxu0 }
 0x3bc   : > { %v982_v17 = vmul.f32 %v1527_v0, %v2362_v10  ;;  %v926_v19 = vpop.f32.mrb[11].mxu0 }
 0x3bd   : > { %v981_v4 = vmul.f32 %v926_v19, %v2354_v8  ;;  %1716 = vmatprep.subr.bf16.mxu1 %v1715_v1 }
 0x3be   : > { %1718 = vmatpush3.bf16.msra.mxu1 %v1715_v1 }
 0x3bf   : > { %v1719_v2 = vpack.c.bf16 %v982_v17, %v981_v4  ;;  %v1530_v22 = vpop.f32.mrb[12].mxu0 }
 0x3c0   : > { %v984_v25 = vmul.f32 %v1530_v22, %v2375_v21  ;;  %v936_v26 = vpop.f32.mrb[13].mxu0 }
 0x3c1   : > { %v983_v7 = vmul.f32 %v936_v26, %v2373_v20  ;;  %1720 = vmatprep.subr.bf16.mxu1 %v1719_v2 }
 0x3c2   : > { %1722 = vmatpush3.bf16.msra.mxu1 %v1719_v2 }
 0x3c3   : > { %v1723_v6 = vpack.c.bf16 %v984_v25, %v983_v7  ;;  %v1533_v29 = vpop.f32.mrb[14].mxu0 }
 0x3c4   : > { %v986_v30 = vmul.f32 %v1533_v29, %v2387_v24  ;;  %v946_v31 = vpop.f32.mrb[15].mxu0 }
 0x3c5   : > { %v985_v10 = vmul.f32 %v946_v31, %v2385_v23  ;;  %1724 = vmatprep.subr.bf16.mxu1 %v1723_v6 }
 0x3c6   : > { %1726 = vmatpush3.bf16.msra.mxu1 %v1723_v6 }
 0x3c7   : > { %v1727_v8 = vpack.c.bf16 %v986_v30, %v985_v10  ;;  %v1536_v32 = vpop.f32.mrb[16].mxu0 }
 0x3c8   : > { %v988_v33 = vmul.f32 %v1536_v32, %v2399_v28  ;;  %v956_v34 = vpop.f32.mrb[17].mxu0  ;;  %v1237_v28 = vmul.f32 -1.442695, %v2503_v60 }
 0x3c9   : > { %v987_v21 = vmul.f32 %v956_v34, %v2397_v27  ;;  %1728 = vmatprep.subr.bf16.mxu1 %v1727_v8  ;;  %v1238_v27 = vmul.f32 -1.442695, %v2501_v59 }
 0x3ca   : > { %1730 = vmatpush3.bf16.msra.mxu1 %v1727_v8 }
 0x3cb   : > { %v1731_v20 = vpack.c.bf16 %v988_v33, %v987_v21  ;;  %v1539_v35 = vpop.f32.mrb[18].mxu0  ;;  %1841 = vpow2.f32 %v1238_v27 }
 0x3cc   : > { %v990_v38 = vmul.f32 %v1539_v35, %v2411_v37  ;;  %v966_v39 = vpop.f32.mrb[19].mxu0  ;;  %1843 = vpow2.f32 %v1237_v28 }
 0x3cd   : > { %v989_v24 = vmul.f32 %v966_v39, %v2409_v36  ;;  %1732 = vmatprep.subr.bf16.mxu1 %v1731_v20 }
 0x3ce   : > { %1734 = vmatpush3.bf16.msra.mxu1 %v1731_v20 }
 0x3cf   : > { %v1735_v23 = vpack.c.bf16 %v990_v38, %v989_v24 }
 0x3d1   : > { %1736 = vmatprep.subr.bf16.mxu1 %v1735_v23 }
 0x3d2   : > { %1738 = vmatpush3.bf16.msra.mxu1 %v1735_v23 }
 0x3d5   : > { %1573 = vmatmul.mubr.f32.vlgmr.msra.gmra.mrb[4].mxu1 %v2490_v18  ;;  %v1842_v44 = vpop.eup %1841 }
 0x3d6   : > { %v1844_v37 = vpop.eup %1843  ;;  %v717_v43 = vadd.f32 1.0, %v1842_v44 }
 0x3d7   : > { %v716_v45 = vadd.f32 1.0, %v1844_v37 }
 0x3d8   : > { %1845 = vrcp.f32 %v717_v43 }
 0x3d9   : > { %1847 = vrcp.f32 %v716_v45 }
 0x3e2   : > { %v1846_v36 = vpop.eup %1845 }
 0x3e3   : > { %v1848_v18 = vpop.eup %1847 }
 0x4a8   : > { %v1574_v46 = vpop.f32.mrb[4].mxu1 }
 0x4a9   : > { %v1067_v59 = vmul.f32 %v1846_v36, %v1574_v46  ;;  %v1057_v60 = vpop.f32.mrb[5].mxu1 }
 0x4aa   : > { %v1066_v47 = vmul.f32 %v1848_v18, %v1057_v60 }
 0x4ab   : > { %1069 = vst [vmem:[%s307_s11 + $0x8] sm:$0xff] %v1067_v59 }
 0x4ac   : > { %1068 = vst [vmem:[%s307_s11] sm:$0xff] %v1066_v47 }
 0x4ad   : > { %1980 = shalt.err (!%p1977_p4)
}
 0x4ae   : > { %s1981_s21 = scalar_lea.hbm %s2550_s10, 256  ;;  %s1985_s1 = scalar_lea.hbm %s2598_s4, 512 }
 0x4af   : > { %p1982_p1 = scmp.ne.s32.totalorder %s2550_s10, %s1981_s21  ;;  %p1986_p7 = scmp.lt.u32.totalorder %s2550_s10, %s2598_s4 }
 0x4b0   : > { %p1987_p11 = scmp.lt.u32.totalorder %s1985_s1, %s1981_s21  ;;  %p1989_p2 = scmp.lt.u32.totalorder %s1981_s21, %s2550_s10 }
 0x4b1   : > { %p1983_p5 = pnand %p1982_p1, %p2643_p12 }
 0x4b2   : > { %p1988_p0 = por %p1987_p11, %p1986_p7 }
 0x4b3   : > { %p1984_p8 = pneg %p1983_p5 }
 0x4b4   : > { %p1990_p10 = por %p1989_p2, %p1988_p0 }
 0x4b6   : > { %p1991_p13 = pnand %p1990_p10, %p1984_p8 }
 0x4b8   : > { %1994 = shalt.err (!%p1991_p13)
}
 0x4b9   : > { %s2050_s18 = smov 128   ;;  %s2051_s2 = smov 8  }
 0x4ba   : > { %1749 = dma.vmem_to_hbm [thread:$0]  (%p2643_p12), %s2545_s22, 256, %s2550_s10, %s1071_s13, %s2050_s18, %s2050_s18, %s2051_s2  }
 0x4bb PF: > { %s2644_s24 = sld [smem:[#allocation18_spill]]  ;;  %s2645_s12 = sld [smem:[#allocation15_spill]] }
 0x4bc   : > { %s1099_s28 = sand.u32 1, %s2029_s15  }
 0x4bd   : > { %s1100_s19 = scalar_lea.sflag [#allocation4], %s1099_s28 }
 0x4c1   : > { %p2646_p3 = scmp.ne.s32.totalorder %s2644_s24, 0  ;;  %p2647_p9 = scmp.ge.s32.totalorder %s2645_s12, 2 }
 0x4c3   : > { %p1766_p6 = pnand %p2647_p9, %p2646_p3 }
 0x4c5   : > { %2024 = dma.done.wait (!%p1766_p6), %s1100_s19, 256  }
 0x4c6   : > { %2026 = vsyncadd (!%p1766_p6), %s1100_s19, 4294967040  ;;  %s2648_s18 = sld [smem:[#allocation16_spill]]  ;;  %s2649_s11 = sld [smem:[#allocation17_spill]] }
 0x4c7   : > { %s2650_s15 = smov %s2033_s16  ;;  %s2651_s16 = smov %s2037_s17 }
 0x4cc   : > { %p21_p4 = scmp.ge.s32.totalorder %s2648_s18, 4   ;;  %s2652_s17 = smov %s2649_s11 }
 0x4ce   :  { %23 = sbr.rel (!%p21_p4) target bundleno = 11 (0xb), region = 110 }
 0x4d5   :  { %1105 = vsyncpa [#allocation3], 1 }
 0x4d6   :  { %1107 = vsyncpa [#allocation3 + $0x1], 1 }
 0x4d7   :  { %1108 = vsyncpa [#allocation6], 1 }
 0x4d8   :  { %1110 = vsyncpa [#allocation6 + $0x1], 1 }
 0x4d9   :  { %1111 = vsyncpa [#allocation9], 1 }
 0x4da   :  { %1113 = vsyncpa [#allocation9 + $0x1], 1 }
 0x4db   :  { %1114 = vsyncpa [#allocation4], 1 }
 0x4dc   :  { %1116 = vsyncpa [#allocation4 + $0x1], 1 }

</bundles_post_ra>
